<compile_context>
chip_gen: v5e
topology: v5e:2x2
jax: 0.10.0
libtpu: 0.0.40
codegen_flags: <defaults>
</compile_context>

<pallas_src>
import numpy as np
import jax
import jax.numpy as jnp
from jax import lax
from jax.experimental import pallas as pl
from jax.experimental.pallas import tpu as pltpu


def _round_up(x, m):
    return ((x + m - 1) // m) * m


# --------------------------------------------------------------------------
# Pallas kernel: whole Transition forward for one batch element per grid step
# --------------------------------------------------------------------------
def _transition_kernel(x_ref, s1_ref, b1_ref, w1_ref, b2_ref, w2_ref,
                       b3_ref, w3_ref, o_ref, zbuf_ref, zsh_ref):
    # zbuf: (2, 2, Ho+1, Wo, Pp)  parity planes, zero halo row at row index 0
    # zsh : (2,    Ho+1, Wo, Pp)  column-shifted copies of the j=1 planes
    Ho = zbuf_ref.shape[2] - 1
    Wo = zbuf_ref.shape[3]
    Pp = zbuf_ref.shape[4]
    HoWo = Ho * Wo

    # Re-zero only the halo rows that are actually read (the kh=0 taps read
    # row 0 of the i=1 planes and of zsh[1]); 3 x 4 KB of stores per step.
    # NOTE: the data stores below must never touch these halo rows.
    zrow = jnp.zeros((Wo, Pp), jnp.float32)
    zbuf_ref[1, 0, 0, :, :] = zrow
    zbuf_ref[1, 1, 0, :, :] = zrow
    zsh_ref[1, 0, :, :] = zrow

    # bn1 (folded scale/shift) + relu, channel-major: (Cin, HW) dense vregs.
    x = x_ref[0]                                            # (Cin, HW)
    act = jnp.maximum(x * s1_ref[...] + b1_ref[...], 0.0)

    # conv1 (1x1, groups=2) + shuffle1 + bn2-scale folded into w1 columns:
    # one matmul contracting the Cin (sublane) axis -> (HW, Pp).
    h1 = lax.dot_general(act, w1_ref[...],
                         dimension_numbers=(((0,), (0,)), ((), ())),
                         preferred_element_type=jnp.float32)
    z = jnp.maximum(h1 + b2_ref[...], 0.0)                  # bn2 shift + relu

    # Stage parity blocks.  z rows are pixels ordered (i=h%2, j=w%2, a=h//2,
    # b=w//2); each block stores at column offset 0 (sublane aligned) with the
    # zero halo row at row index 0.  For the kw=0 taps, a column-shifted-by-one
    # copy of the j=1 planes (zero entering at column 0) is built once per
    # row-parity at value level and staged into zsh, so every tap read below
    # is an aligned slice.
    zcol = jnp.zeros((Ho, 1, Pp), jnp.float32)
    for i in range(2):
        for j in range(2):
            blk = z[(i * 2 + j) * HoWo:(i * 2 + j + 1) * HoWo, :]
            blk = blk.reshape(Ho, Wo, Pp)
            zbuf_ref[i, j, 1:, :, :] = blk
            if j == 1:
                zsh_ref[i, 1:, :, :] = jnp.concatenate(
                    [zcol, blk[:, :Wo - 1, :]], axis=1)

    # conv2: depthwise 3x3, stride 2, pad 1 (bn3 scale folded into the taps).
    # Tap (kh, kw) reads parity plane i=(kh+1)%2, j=(kw+1)%2 at row offset rs
    # (0 for kh=0 -> includes the halo row, else 1); kw=0 taps use the
    # pre-shifted zsh planes.  Pure VPU FMAs on (Ho, Wo, Pp) tiles, with the
    # accumulation split per kh to break the serial dependency chain.
    w2 = w2_ref[...]                                        # (9, Pp), one load
    parts = []
    for kh in range(3):
        i = (kh + 1) % 2
        rs = 0 if kh == 0 else 1
        part = None
        for kw in range(3):
            j = (kw + 1) % 2
            if kw == 0:
                g = zsh_ref[i, rs:rs + Ho, :, :]
            else:
                g = zbuf_ref[i, j, rs:rs + Ho, :, :]
            term = g * w2[kh * 3 + kw].reshape(1, 1, Pp)
            part = term if part is None else part + term
        parts.append(part)
    acc = parts[0] + parts[1] + parts[2]                    # (Ho, Wo, Pp)

    # bn3 (shift only; scale folded) + relu.
    u = jnp.maximum(acc.reshape(HoWo, Pp) + b3_ref[...], 0.0)

    # conv3 (1x1, groups=2) + shuffle3 -> one matmul; lane-dense (HoWo, Cp)
    # output block, no in-kernel transpose.
    o_ref[0] = jnp.dot(u, w3_ref[...],
                       preferred_element_type=jnp.float32).astype(o_ref.dtype)


def transition_forward(x_nchw, kernel_params, out_planes):
    s1, b1, w1p, b2, w2s, b3, w3p = kernel_params
    N, Cin, H, W = x_nchw.shape
    assert H % 2 == 0 and W % 2 == 0, "even spatial dims required"
    Ho, Wo = H // 2, W // 2
    HW = H * W
    Pp = w1p.shape[1]
    Cp = w3p.shape[1]

    # NCHW -> channel-major with parity-major pixel columns:
    #   x_cm[n, c, ((i*2+j)*Ho + a)*Wo + b] = x[n, c, 2a+i, 2b+j]
    x_cm = (x_nchw.reshape(N, Cin, Ho, 2, Wo, 2)
            .transpose(0, 1, 3, 5, 2, 4)
            .reshape(N, Cin, HW))

    out = pl.pallas_call(
        _transition_kernel,
        out_shape=jax.ShapeDtypeStruct((N, Ho * Wo, Cp), jnp.float32),
        grid=(N,),
        in_specs=[
            pl.BlockSpec((1, Cin, HW), lambda n: (n, 0, 0)),   # x (channel-major)
            pl.BlockSpec((Cin, 1), lambda n: (0, 0)),          # bn1 scale
            pl.BlockSpec((Cin, 1), lambda n: (0, 0)),          # bn1 shift
            pl.BlockSpec((Cin, Pp), lambda n: (0, 0)),         # conv1 (+shuffle1, *s2)
            pl.BlockSpec((1, Pp), lambda n: (0, 0)),           # bn2 shift
            pl.BlockSpec((9, Pp), lambda n: (0, 0)),           # depthwise taps (*s3)
            pl.BlockSpec((1, Pp), lambda n: (0, 0)),           # bn3 shift
            pl.BlockSpec((Pp, Cp), lambda n: (0, 0)),          # conv3 (+shuffle3)
        ],
        out_specs=pl.BlockSpec((1, Ho * Wo, Cp), lambda n: (n, 0, 0)),
        scratch_shapes=[
            pltpu.VMEM((2, 2, Ho + 1, Wo, Pp), jnp.float32),   # parity planes
            pltpu.VMEM((2, Ho + 1, Wo, Pp), jnp.float32),      # col-shifted j=1 planes
        ],
        compiler_params=pltpu.CompilerParams(
            dimension_semantics=("parallel",)),
    )(x_cm, s1, b1, w1p, b2, w2s, b3, w3p)

    # Lane-dense (N, HoWo, Cp) -> NCHW: slice padded channels, tiny transpose.
    out = out[:, :, :out_planes]
    return out.transpose(0, 2, 1).reshape(N, out_planes, Ho, Wo)


# --------------------------------------------------------------------------
# Parameter construction (deterministic, torch-shaped) and folding into the
# kernel's fused representation.
# --------------------------------------------------------------------------
def _shuffle_perm(C, g):
    # ShuffleBlock(g): out[:, c] = in[:, perm[c]]
    return np.array([(c % g) * (C // g) + c // g for c in range(C)], dtype=np.int64)


def _grouped_1x1_dense(w_oihw, groups):
    # torch weight (O, I/g, 1, 1) -> dense block-diagonal (I, O) matrix
    O, Ig = w_oihw.shape[:2]
    og = O // groups
    dense = np.zeros((Ig * groups, O), dtype=np.float32)
    for g in range(groups):
        dense[g * Ig:(g + 1) * Ig, g * og:(g + 1) * og] = \
            w_oihw[g * og:(g + 1) * og, :, 0, 0].T
    return dense


def _fold_bn(gamma, beta, mean, var, eps=1e-5):
    scale = (gamma / np.sqrt(var + eps)).astype(np.float32)
    shift = (beta - mean * scale).astype(np.float32)
    return scale, shift


def init_params(key, in_planes, out_planes):
    planes = in_planes * 2
    Pp = _round_up(planes, 128)          # lane-dense padded width, conv1 outputs
    Cp = _round_up(out_planes, 128)      # lane-dense padded width, conv3 outputs
    ks = jax.random.split(key, 16)

    def normal(k, shape, scale):
        return np.asarray(jax.random.normal(k, shape, dtype=jnp.float32)) * scale

    # torch-shaped conv weights
    w1 = normal(ks[0], (planes, in_planes // 2, 1, 1), 0.5)        # groups=2
    w2 = normal(ks[1], (planes, 1, 3, 3), 0.5)                     # depthwise
    w3 = normal(ks[2], (out_planes, planes // 2, 1, 1), 0.5)       # groups=2

    def bn_params(kg, kb, km, kv, C):
        gamma = 1.0 + normal(kg, (C,), 0.1)
        beta = normal(kb, (C,), 0.1)
        mean = normal(km, (C,), 0.1)
        var = 1.0 + np.abs(normal(kv, (C,), 0.3))
        return gamma, beta, mean, var

    bn1 = bn_params(ks[3], ks[4], ks[5], ks[6], in_planes)
    bn2 = bn_params(ks[7], ks[8], ks[9], ks[10], planes)
    bn3 = bn_params(ks[11], ks[12], ks[13], ks[14], planes)

    # ---- fold into the kernel representation ----
    s1, b1 = _fold_bn(*bn1)
    s2, b2 = _fold_bn(*bn2)
    s3, b3 = _fold_bn(*bn3)

    perm1 = _shuffle_perm(planes, 2)
    w1f = _grouped_1x1_dense(w1, 2)[:, perm1] * s2[None, :]        # (Cin, planes)
    w2s = w2[:, 0].reshape(planes, 9).T * s3[None, :]              # (9, planes)
    perm3 = _shuffle_perm(out_planes, 2)
    w3f = _grouped_1x1_dense(w3, 2)[:, perm3]                      # (planes, Cout)

    # zero-pad channel dims to 128 lanes (padded channels stay exactly zero
    # through the relus because their biases are zero too)
    w1p = np.zeros((in_planes, Pp), np.float32); w1p[:, :planes] = w1f
    b2p = np.zeros((1, Pp), np.float32);         b2p[0, :planes] = b2
    w2p = np.zeros((9, Pp), np.float32);         w2p[:, :planes] = w2s
    b3p = np.zeros((1, Pp), np.float32);         b3p[0, :planes] = b3
    w3p = np.zeros((Pp, Cp), np.float32);        w3p[:planes, :out_planes] = w3f

    kernel_params = (
        jnp.asarray(s1.reshape(in_planes, 1)),   # bn1 scale (channel-major)
        jnp.asarray(b1.reshape(in_planes, 1)),   # bn1 shift
        jnp.asarray(w1p),                        # conv1 fused weight (f32)
        jnp.asarray(b2p),                        # bn2 shift
        jnp.asarray(w2p),                        # depthwise taps (*s3)
        jnp.asarray(b3p),                        # bn3 shift
        jnp.asarray(w3p),                        # conv3 fused weight (f32)
    )
    torch_params = (jnp.asarray(w1), jnp.asarray(w2), jnp.asarray(w3),
                    bn1, bn2, bn3)
    return kernel_params, torch_params


# --------------------------------------------------------------------------
# Pure-JAX reference (mirrors the PyTorch forward, eval-mode BN) for checking
# --------------------------------------------------------------------------
def reference_forward(x, torch_params, eps=1e-5):
    w1, w2, w3, bn1, bn2, bn3 = torch_params

    def bn_apply(t, p):
        g, b, m, v = (jnp.asarray(a)[None, :, None, None] for a in p)
        return (t - m) / jnp.sqrt(v + eps) * g + b

    def shuffle(t, g):
        N, C, H, W = t.shape
        return t.reshape(N, g, C // g, H, W).transpose(0, 2, 1, 3, 4).reshape(N, C, H, W)

    dn = ('NCHW', 'OIHW', 'NCHW')
    hi = lax.Precision.HIGHEST
    out = lax.conv_general_dilated(jnp.maximum(bn_apply(x, bn1), 0.0), w1,
                                   (1, 1), ((0, 0), (0, 0)),
                                   feature_group_count=2,
                                   dimension_numbers=dn, precision=hi)
    out = shuffle(out, 2)
    out = lax.conv_general_dilated(jnp.maximum(bn_apply(out, bn2), 0.0), w2,
                                   (2, 2), ((1, 1), (1, 1)),
                                   feature_group_count=w2.shape[0],
                                   dimension_numbers=dn, precision=hi)
    out = lax.conv_general_dilated(jnp.maximum(bn_apply(out, bn3), 0.0), w3,
                                   (1, 1), ((0, 0), (0, 0)),
                                   feature_group_count=2,
                                   dimension_numbers=dn, precision=hi)
    out = shuffle(out, 2)
    return out


if __name__ == "__main__":
    key = jax.random.PRNGKey(0)
    kx, kp = jax.random.split(key)

    N, in_planes, H, W = 2, 8, 16, 16
    out_planes = 16

    x = jax.random.normal(kx, (N, in_planes, H, W), dtype=jnp.float32)
    kernel_params, torch_params = init_params(kp, in_planes, out_planes)

    out = jax.block_until_ready(transition_forward(x, kernel_params, out_planes))
    ref = jax.block_until_ready(reference_forward(x, torch_params))

    assert out.shape == (N, out_planes, H // 2, W // 2), out.shape
    if not np.allclose(np.asarray(out), np.asarray(ref), rtol=5e-2, atol=5e-2):
        max_err = float(np.max(np.abs(np.asarray(out) - np.asarray(ref))))
        raise AssertionError(f"kernel/reference mismatch, max abs err = {max_err}")

    print("KERNEL_OK")
</pallas_src>

<mosaic_0001>
module attributes {stable_mosaic.version = 11 : i64} {
  func.func @_transition_kernel(%arg0: i32, %arg1: memref<1x8x256xf32, #tpu.memory_space<vmem>>, %arg2: memref<8x1xf32, #tpu.memory_space<vmem>>, %arg3: memref<8x1xf32, #tpu.memory_space<vmem>>, %arg4: memref<8x128xf32, #tpu.memory_space<vmem>>, %arg5: memref<1x128xf32, #tpu.memory_space<vmem>>, %arg6: memref<9x128xf32, #tpu.memory_space<vmem>>, %arg7: memref<1x128xf32, #tpu.memory_space<vmem>>, %arg8: memref<128x128xf32, #tpu.memory_space<vmem>>, %arg9: memref<1x64x128xf32, #tpu.memory_space<vmem>>, %arg10: memref<2x2x9x8x128xf32, #tpu.memory_space<vmem>>, %arg11: memref<2x9x8x128xf32, #tpu.memory_space<vmem>>) attributes {dimension_semantics = [#tpu.dimension_semantics<parallel>], iteration_bounds = array<i64: 2>, scalar_prefetch = 0 : i64, scratch_operands = 2 : i64, tpu.core_type = #tpu.core_type<tc>, window_params = [{transform_indices = @transform_0, window_bounds = array<i64: 1, 8, 256>}, {pipeline_mode = #tpu.pipeline_mode<synchronous>, transform_indices = @transform_1, window_bounds = array<i64: 8, 1>}, {pipeline_mode = #tpu.pipeline_mode<synchronous>, transform_indices = @transform_2, window_bounds = array<i64: 8, 1>}, {pipeline_mode = #tpu.pipeline_mode<synchronous>, transform_indices = @transform_3, window_bounds = array<i64: 8, 128>}, {pipeline_mode = #tpu.pipeline_mode<synchronous>, transform_indices = @transform_4, window_bounds = array<i64: 1, 128>}, {pipeline_mode = #tpu.pipeline_mode<synchronous>, transform_indices = @transform_5, window_bounds = array<i64: 9, 128>}, {pipeline_mode = #tpu.pipeline_mode<synchronous>, transform_indices = @transform_6, window_bounds = array<i64: 1, 128>}, {pipeline_mode = #tpu.pipeline_mode<synchronous>, transform_indices = @transform_7, window_bounds = array<i64: 128, 128>}, {transform_indices = @transform_8, window_bounds = array<i64: 1, 64, 128>}]} {
    %cst = arith.constant 0.000000e+00 : f32
    %0 = vector.broadcast %cst : f32 to vector<8x128xf32>
    %c1 = arith.constant 1 : index
    %c0 = arith.constant 0 : index
    %c0_0 = arith.constant 0 : index
    %c0_1 = arith.constant 0 : index
    %c0_2 = arith.constant 0 : index
    %1 = vector.load %arg10[%c1, %c0, %c0_0, %c0_1, %c0_2] : memref<2x2x9x8x128xf32, #tpu.memory_space<vmem>>, vector<1x1x1x8x128xf32>
    %2 = vector.shape_cast %1 : vector<1x1x1x8x128xf32> to vector<8x128xf32>
    %3 = vector.shape_cast %0 : vector<8x128xf32> to vector<1x1x1x8x128xf32>
    tpu.vector_store %arg10[%c1, %c0, %c0_0, %c0_1, %c0_2], %3 {strides = array<i32>} : memref<2x2x9x8x128xf32, #tpu.memory_space<vmem>>, vector<1x1x1x8x128xf32>,
    %c1_3 = arith.constant 1 : index
    %c1_4 = arith.constant 1 : index
    %c0_5 = arith.constant 0 : index
    %c0_6 = arith.constant 0 : index
    %c0_7 = arith.constant 0 : index
    %4 = vector.load %arg10[%c1_3, %c1_4, %c0_5, %c0_6, %c0_7] : memref<2x2x9x8x128xf32, #tpu.memory_space<vmem>>, vector<1x1x1x8x128xf32>
    %5 = vector.shape_cast %4 : vector<1x1x1x8x128xf32> to vector<8x128xf32>
    %6 = vector.shape_cast %0 : vector<8x128xf32> to vector<1x1x1x8x128xf32>
    tpu.vector_store %arg10[%c1_3, %c1_4, %c0_5, %c0_6, %c0_7], %6 {strides = array<i32>} : memref<2x2x9x8x128xf32, #tpu.memory_space<vmem>>, vector<1x1x1x8x128xf32>,
    %c1_8 = arith.constant 1 : index
    %c0_9 = arith.constant 0 : index
    %c0_10 = arith.constant 0 : index
    %c0_11 = arith.constant 0 : index
    %7 = vector.load %arg11[%c1_8, %c0_9, %c0_10, %c0_11] : memref<2x9x8x128xf32, #tpu.memory_space<vmem>>, vector<1x1x8x128xf32>
    %8 = vector.shape_cast %7 : vector<1x1x8x128xf32> to vector<8x128xf32>
    %9 = vector.shape_cast %0 : vector<8x128xf32> to vector<1x1x8x128xf32>
    tpu.vector_store %arg11[%c1_8, %c0_9, %c0_10, %c0_11], %9 {strides = array<i32>} : memref<2x9x8x128xf32, #tpu.memory_space<vmem>>, vector<1x1x8x128xf32>,
    %c0_12 = arith.constant 0 : index
    %c0_13 = arith.constant 0 : index
    %c0_14 = arith.constant 0 : index
    %10 = vector.load %arg1[%c0_12, %c0_13, %c0_14] : memref<1x8x256xf32, #tpu.memory_space<vmem>>, vector<1x8x256xf32>
    %11 = vector.shape_cast %10 : vector<1x8x256xf32> to vector<8x256xf32>
    %c0_15 = arith.constant 0 : index
    %c0_16 = arith.constant 0 : index
    %12 = vector.load %arg2[%c0_15, %c0_16] : memref<8x1xf32, #tpu.memory_space<vmem>>, vector<8x1xf32>
    %13 = vector.broadcast %12 : vector<8x1xf32> to vector<8x256xf32>
    %14 = arith.mulf %11, %13 : vector<8x256xf32>
    %c0_17 = arith.constant 0 : index
    %c0_18 = arith.constant 0 : index
    %15 = vector.load %arg3[%c0_17, %c0_18] : memref<8x1xf32, #tpu.memory_space<vmem>>, vector<8x1xf32>
    %16 = vector.broadcast %15 : vector<8x1xf32> to vector<8x256xf32>
    %17 = arith.addf %14, %16 : vector<8x256xf32>
    %cst_19 = arith.constant 0.000000e+00 : f32
    %18 = vector.broadcast %cst_19 : f32 to vector<8x256xf32>
    %19 = arith.maximumf %17, %18 : vector<8x256xf32>
    %c0_20 = arith.constant 0 : index
    %c0_21 = arith.constant 0 : index
    %20 = vector.load %arg4[%c0_20, %c0_21] : memref<8x128xf32, #tpu.memory_space<vmem>>, vector<8x128xf32>
    %cst_22 = arith.constant dense<0.000000e+00> : vector<256x128xf32>
    %21 = tpu.matmul %19, %20, %cst_22 {dimension_numbers = #tpu.dot_dimension_numbers<[0], [0], [1], [1], [0, 1, 1, 1], [], []>} : vector<8x256xf32>, vector<8x128xf32>, vector<256x128xf32> -> vector<256x128xf32>
    %c0_23 = arith.constant 0 : index
    %c0_24 = arith.constant 0 : index
    %22 = vector.load %arg5[%c0_23, %c0_24] : memref<1x128xf32, #tpu.memory_space<vmem>>, vector<1x128xf32>
    %23 = vector.broadcast %22 : vector<1x128xf32> to vector<256x128xf32>
    %24 = arith.addf %21, %23 : vector<256x128xf32>
    %cst_25 = arith.constant 0.000000e+00 : f32
    %25 = vector.broadcast %cst_25 : f32 to vector<256x128xf32>
    %26 = arith.maximumf %24, %25 : vector<256x128xf32>
    %cst_26 = arith.constant 0.000000e+00 : f32
    %27 = vector.broadcast %cst_26 : f32 to vector<8x1x128xf32>
    %28 = vector.extract_strided_slice %26 {offsets = [0, 0], sizes = [64, 128], strides = [1, 1]} : vector<256x128xf32> to vector<64x128xf32>
    %29 = vector.shape_cast %28 : vector<64x128xf32> to vector<8x8x128xf32>
    %c0_27 = arith.constant 0 : index
    %c0_28 = arith.constant 0 : index
    %c1_29 = arith.constant 1 : index
    %c0_30 = arith.constant 0 : index
    %c0_31 = arith.constant 0 : index
    %30 = vector.load %arg10[%c0_27, %c0_28, %c1_29, %c0_30, %c0_31] : memref<2x2x9x8x128xf32, #tpu.memory_space<vmem>>, vector<1x1x8x8x128xf32>
    %31 = vector.shape_cast %30 : vector<1x1x8x8x128xf32> to vector<8x8x128xf32>
    %32 = vector.shape_cast %29 : vector<8x8x128xf32> to vector<1x1x8x8x128xf32>
    tpu.vector_store %arg10[%c0_27, %c0_28, %c1_29, %c0_30, %c0_31], %32 {strides = array<i32>} : memref<2x2x9x8x128xf32, #tpu.memory_space<vmem>>, vector<1x1x8x8x128xf32>,
    %33 = vector.extract_strided_slice %26 {offsets = [64, 0], sizes = [64, 128], strides = [1, 1]} : vector<256x128xf32> to vector<64x128xf32>
    %34 = vector.shape_cast %33 : vector<64x128xf32> to vector<8x8x128xf32>
    %c0_32 = arith.constant 0 : index
    %c1_33 = arith.constant 1 : index
    %c1_34 = arith.constant 1 : index
    %c0_35 = arith.constant 0 : index
    %c0_36 = arith.constant 0 : index
    %35 = vector.load %arg10[%c0_32, %c1_33, %c1_34, %c0_35, %c0_36] : memref<2x2x9x8x128xf32, #tpu.memory_space<vmem>>, vector<1x1x8x8x128xf32>
    %36 = vector.shape_cast %35 : vector<1x1x8x8x128xf32> to vector<8x8x128xf32>
    %37 = vector.shape_cast %34 : vector<8x8x128xf32> to vector<1x1x8x8x128xf32>
    tpu.vector_store %arg10[%c0_32, %c1_33, %c1_34, %c0_35, %c0_36], %37 {strides = array<i32>} : memref<2x2x9x8x128xf32, #tpu.memory_space<vmem>>, vector<1x1x8x8x128xf32>,
    %38 = vector.extract_strided_slice %34 {offsets = [0, 0, 0], sizes = [8, 7, 128], strides = [1, 1, 1]} : vector<8x8x128xf32> to vector<8x7x128xf32>
    %39 = tpu.concatenate %27, %38 in 1 : vector<8x1x128xf32>, vector<8x7x128xf32> -> vector<8x8x128xf32>
    %c0_37 = arith.constant 0 : index
    %c1_38 = arith.constant 1 : index
    %c0_39 = arith.constant 0 : index
    %c0_40 = arith.constant 0 : index
    %40 = vector.load %arg11[%c0_37, %c1_38, %c0_39, %c0_40] : memref<2x9x8x128xf32, #tpu.memory_space<vmem>>, vector<1x8x8x128xf32>
    %41 = vector.shape_cast %40 : vector<1x8x8x128xf32> to vector<8x8x128xf32>
    %42 = vector.shape_cast %39 : vector<8x8x128xf32> to vector<1x8x8x128xf32>
    tpu.vector_store %arg11[%c0_37, %c1_38, %c0_39, %c0_40], %42 {strides = array<i32>} : memref<2x9x8x128xf32, #tpu.memory_space<vmem>>, vector<1x8x8x128xf32>,
    %43 = vector.extract_strided_slice %26 {offsets = [128, 0], sizes = [64, 128], strides = [1, 1]} : vector<256x128xf32> to vector<64x128xf32>
    %44 = vector.shape_cast %43 : vector<64x128xf32> to vector<8x8x128xf32>
    %c1_41 = arith.constant 1 : index
    %c0_42 = arith.constant 0 : index
    %c1_43 = arith.constant 1 : index
    %c0_44 = arith.constant 0 : index
    %c0_45 = arith.constant 0 : index
    %45 = vector.load %arg10[%c1_41, %c0_42, %c1_43, %c0_44, %c0_45] : memref<2x2x9x8x128xf32, #tpu.memory_space<vmem>>, vector<1x1x8x8x128xf32>
    %46 = vector.shape_cast %45 : vector<1x1x8x8x128xf32> to vector<8x8x128xf32>
    %47 = vector.shape_cast %44 : vector<8x8x128xf32> to vector<1x1x8x8x128xf32>
    tpu.vector_store %arg10[%c1_41, %c0_42, %c1_43, %c0_44, %c0_45], %47 {strides = array<i32>} : memref<2x2x9x8x128xf32, #tpu.memory_space<vmem>>, vector<1x1x8x8x128xf32>,
    %48 = vector.extract_strided_slice %26 {offsets = [192, 0], sizes = [64, 128], strides = [1, 1]} : vector<256x128xf32> to vector<64x128xf32>
    %49 = vector.shape_cast %48 : vector<64x128xf32> to vector<8x8x128xf32>
    %c1_46 = arith.constant 1 : index
    %c1_47 = arith.constant 1 : index
    %c1_48 = arith.constant 1 : index
    %c0_49 = arith.constant 0 : index
    %c0_50 = arith.constant 0 : index
    %50 = vector.load %arg10[%c1_46, %c1_47, %c1_48, %c0_49, %c0_50] : memref<2x2x9x8x128xf32, #tpu.memory_space<vmem>>, vector<1x1x8x8x128xf32>
    %51 = vector.shape_cast %50 : vector<1x1x8x8x128xf32> to vector<8x8x128xf32>
    %52 = vector.shape_cast %49 : vector<8x8x128xf32> to vector<1x1x8x8x128xf32>
    tpu.vector_store %arg10[%c1_46, %c1_47, %c1_48, %c0_49, %c0_50], %52 {strides = array<i32>} : memref<2x2x9x8x128xf32, #tpu.memory_space<vmem>>, vector<1x1x8x8x128xf32>,
    %53 = vector.extract_strided_slice %49 {offsets = [0, 0, 0], sizes = [8, 7, 128], strides = [1, 1, 1]} : vector<8x8x128xf32> to vector<8x7x128xf32>
    %54 = tpu.concatenate %27, %53 in 1 : vector<8x1x128xf32>, vector<8x7x128xf32> -> vector<8x8x128xf32>
    %c1_51 = arith.constant 1 : index
    %c1_52 = arith.constant 1 : index
    %c0_53 = arith.constant 0 : index
    %c0_54 = arith.constant 0 : index
    %55 = vector.load %arg11[%c1_51, %c1_52, %c0_53, %c0_54] : memref<2x9x8x128xf32, #tpu.memory_space<vmem>>, vector<1x8x8x128xf32>
    %56 = vector.shape_cast %55 : vector<1x8x8x128xf32> to vector<8x8x128xf32>
    %57 = vector.shape_cast %54 : vector<8x8x128xf32> to vector<1x8x8x128xf32>
    tpu.vector_store %arg11[%c1_51, %c1_52, %c0_53, %c0_54], %57 {strides = array<i32>} : memref<2x9x8x128xf32, #tpu.memory_space<vmem>>, vector<1x8x8x128xf32>,
    %c0_55 = arith.constant 0 : index
    %c0_56 = arith.constant 0 : index
    %58 = vector.load %arg6[%c0_55, %c0_56] : memref<9x128xf32, #tpu.memory_space<vmem>>, vector<9x128xf32>
    %c1_57 = arith.constant 1 : index
    %c0_58 = arith.constant 0 : index
    %c0_59 = arith.constant 0 : index
    %c0_60 = arith.constant 0 : index
    %59 = vector.load %arg11[%c1_57, %c0_58, %c0_59, %c0_60] : memref<2x9x8x128xf32, #tpu.memory_space<vmem>>, vector<1x8x8x128xf32>
    %60 = vector.shape_cast %59 : vector<1x8x8x128xf32> to vector<8x8x128xf32>
    %61 = vector.extract_strided_slice %58 {offsets = [0, 0], sizes = [1, 128], strides = [1, 1]} : vector<9x128xf32> to vector<1x128xf32>
    %62 = vector.shape_cast %61 : vector<1x128xf32> to vector<128xf32>
    %63 = vector.shape_cast %62 : vector<128xf32> to vector<1x1x128xf32>
    %64 = vector.broadcast %63 : vector<1x1x128xf32> to vector<8x8x128xf32>
    %65 = arith.mulf %60, %64 : vector<8x8x128xf32>
    %c1_61 = arith.constant 1 : index
    %c0_62 = arith.constant 0 : index
    %c0_63 = arith.constant 0 : index
    %c0_64 = arith.constant 0 : index
    %c0_65 = arith.constant 0 : index
    %66 = vector.load %arg10[%c1_61, %c0_62, %c0_63, %c0_64, %c0_65] : memref<2x2x9x8x128xf32, #tpu.memory_space<vmem>>, vector<1x1x8x8x128xf32>
    %67 = vector.shape_cast %66 : vector<1x1x8x8x128xf32> to vector<8x8x128xf32>
    %68 = vector.extract_strided_slice %58 {offsets = [1, 0], sizes = [1, 128], strides = [1, 1]} : vector<9x128xf32> to vector<1x128xf32>
    %69 = vector.shape_cast %68 : vector<1x128xf32> to vector<128xf32>
    %70 = vector.shape_cast %69 : vector<128xf32> to vector<1x1x128xf32>
    %71 = vector.broadcast %70 : vector<1x1x128xf32> to vector<8x8x128xf32>
    %72 = arith.mulf %67, %71 : vector<8x8x128xf32>
    %73 = arith.addf %65, %72 : vector<8x8x128xf32>
    %c1_66 = arith.constant 1 : index
    %c1_67 = arith.constant 1 : index
    %c0_68 = arith.constant 0 : index
    %c0_69 = arith.constant 0 : index
    %c0_70 = arith.constant 0 : index
    %74 = vector.load %arg10[%c1_66, %c1_67, %c0_68, %c0_69, %c0_70] : memref<2x2x9x8x128xf32, #tpu.memory_space<vmem>>, vector<1x1x8x8x128xf32>
    %75 = vector.shape_cast %74 : vector<1x1x8x8x128xf32> to vector<8x8x128xf32>
    %76 = vector.extract_strided_slice %58 {offsets = [2, 0], sizes = [1, 128], strides = [1, 1]} : vector<9x128xf32> to vector<1x128xf32>
    %77 = vector.shape_cast %76 : vector<1x128xf32> to vector<128xf32>
    %78 = vector.shape_cast %77 : vector<128xf32> to vector<1x1x128xf32>
    %79 = vector.broadcast %78 : vector<1x1x128xf32> to vector<8x8x128xf32>
    %80 = arith.mulf %75, %79 : vector<8x8x128xf32>
    %81 = arith.addf %73, %80 : vector<8x8x128xf32>
    %c0_71 = arith.constant 0 : index
    %c1_72 = arith.constant 1 : index
    %c0_73 = arith.constant 0 : index
    %c0_74 = arith.constant 0 : index
    %82 = vector.load %arg11[%c0_71, %c1_72, %c0_73, %c0_74] : memref<2x9x8x128xf32, #tpu.memory_space<vmem>>, vector<1x8x8x128xf32>
    %83 = vector.shape_cast %82 : vector<1x8x8x128xf32> to vector<8x8x128xf32>
    %84 = vector.extract_strided_slice %58 {offsets = [3, 0], sizes = [1, 128], strides = [1, 1]} : vector<9x128xf32> to vector<1x128xf32>
    %85 = vector.shape_cast %84 : vector<1x128xf32> to vector<128xf32>
    %86 = vector.shape_cast %85 : vector<128xf32> to vector<1x1x128xf32>
    %87 = vector.broadcast %86 : vector<1x1x128xf32> to vector<8x8x128xf32>
    %88 = arith.mulf %83, %87 : vector<8x8x128xf32>
    %c0_75 = arith.constant 0 : index
    %c0_76 = arith.constant 0 : index
    %c1_77 = arith.constant 1 : index
    %c0_78 = arith.constant 0 : index
    %c0_79 = arith.constant 0 : index
    %89 = vector.load %arg10[%c0_75, %c0_76, %c1_77, %c0_78, %c0_79] : memref<2x2x9x8x128xf32, #tpu.memory_space<vmem>>, vector<1x1x8x8x128xf32>
    %90 = vector.shape_cast %89 : vector<1x1x8x8x128xf32> to vector<8x8x128xf32>
    %91 = vector.extract_strided_slice %58 {offsets = [4, 0], sizes = [1, 128], strides = [1, 1]} : vector<9x128xf32> to vector<1x128xf32>
    %92 = vector.shape_cast %91 : vector<1x128xf32> to vector<128xf32>
    %93 = vector.shape_cast %92 : vector<128xf32> to vector<1x1x128xf32>
    %94 = vector.broadcast %93 : vector<1x1x128xf32> to vector<8x8x128xf32>
    %95 = arith.mulf %90, %94 : vector<8x8x128xf32>
    %96 = arith.addf %88, %95 : vector<8x8x128xf32>
    %c0_80 = arith.constant 0 : index
    %c1_81 = arith.constant 1 : index
    %c1_82 = arith.constant 1 : index
    %c0_83 = arith.constant 0 : index
    %c0_84 = arith.constant 0 : index
    %97 = vector.load %arg10[%c0_80, %c1_81, %c1_82, %c0_83, %c0_84] : memref<2x2x9x8x128xf32, #tpu.memory_space<vmem>>, vector<1x1x8x8x128xf32>
    %98 = vector.shape_cast %97 : vector<1x1x8x8x128xf32> to vector<8x8x128xf32>
    %99 = vector.extract_strided_slice %58 {offsets = [5, 0], sizes = [1, 128], strides = [1, 1]} : vector<9x128xf32> to vector<1x128xf32>
    %100 = vector.shape_cast %99 : vector<1x128xf32> to vector<128xf32>
    %101 = vector.shape_cast %100 : vector<128xf32> to vector<1x1x128xf32>
    %102 = vector.broadcast %101 : vector<1x1x128xf32> to vector<8x8x128xf32>
    %103 = arith.mulf %98, %102 : vector<8x8x128xf32>
    %104 = arith.addf %96, %103 : vector<8x8x128xf32>
    %c1_85 = arith.constant 1 : index
    %c1_86 = arith.constant 1 : index
    %c0_87 = arith.constant 0 : index
    %c0_88 = arith.constant 0 : index
    %105 = vector.load %arg11[%c1_85, %c1_86, %c0_87, %c0_88] : memref<2x9x8x128xf32, #tpu.memory_space<vmem>>, vector<1x8x8x128xf32>
    %106 = vector.shape_cast %105 : vector<1x8x8x128xf32> to vector<8x8x128xf32>
    %107 = vector.extract_strided_slice %58 {offsets = [6, 0], sizes = [1, 128], strides = [1, 1]} : vector<9x128xf32> to vector<1x128xf32>
    %108 = vector.shape_cast %107 : vector<1x128xf32> to vector<128xf32>
    %109 = vector.shape_cast %108 : vector<128xf32> to vector<1x1x128xf32>
    %110 = vector.broadcast %109 : vector<1x1x128xf32> to vector<8x8x128xf32>
    %111 = arith.mulf %106, %110 : vector<8x8x128xf32>
    %c1_89 = arith.constant 1 : index
    %c0_90 = arith.constant 0 : index
    %c1_91 = arith.constant 1 : index
    %c0_92 = arith.constant 0 : index
    %c0_93 = arith.constant 0 : index
    %112 = vector.load %arg10[%c1_89, %c0_90, %c1_91, %c0_92, %c0_93] : memref<2x2x9x8x128xf32, #tpu.memory_space<vmem>>, vector<1x1x8x8x128xf32>
    %113 = vector.shape_cast %112 : vector<1x1x8x8x128xf32> to vector<8x8x128xf32>
    %114 = vector.extract_strided_slice %58 {offsets = [7, 0], sizes = [1, 128], strides = [1, 1]} : vector<9x128xf32> to vector<1x128xf32>
    %115 = vector.shape_cast %114 : vector<1x128xf32> to vector<128xf32>
    %116 = vector.shape_cast %115 : vector<128xf32> to vector<1x1x128xf32>
    %117 = vector.broadcast %116 : vector<1x1x128xf32> to vector<8x8x128xf32>
    %118 = arith.mulf %113, %117 : vector<8x8x128xf32>
    %119 = arith.addf %111, %118 : vector<8x8x128xf32>
    %c1_94 = arith.constant 1 : index
    %c1_95 = arith.constant 1 : index
    %c1_96 = arith.constant 1 : index
    %c0_97 = arith.constant 0 : index
    %c0_98 = arith.constant 0 : index
    %120 = vector.load %arg10[%c1_94, %c1_95, %c1_96, %c0_97, %c0_98] : memref<2x2x9x8x128xf32, #tpu.memory_space<vmem>>, vector<1x1x8x8x128xf32>
    %121 = vector.shape_cast %120 : vector<1x1x8x8x128xf32> to vector<8x8x128xf32>
    %122 = vector.extract_strided_slice %58 {offsets = [8, 0], sizes = [1, 128], strides = [1, 1]} : vector<9x128xf32> to vector<1x128xf32>
    %123 = vector.shape_cast %122 : vector<1x128xf32> to vector<128xf32>
    %124 = vector.shape_cast %123 : vector<128xf32> to vector<1x1x128xf32>
    %125 = vector.broadcast %124 : vector<1x1x128xf32> to vector<8x8x128xf32>
    %126 = arith.mulf %121, %125 : vector<8x8x128xf32>
    %127 = arith.addf %119, %126 : vector<8x8x128xf32>
    %128 = arith.addf %81, %104 : vector<8x8x128xf32>
    %129 = arith.addf %128, %127 : vector<8x8x128xf32>
    %130 = vector.shape_cast %129 : vector<8x8x128xf32> to vector<64x128xf32>
    %c0_99 = arith.constant 0 : index
    %c0_100 = arith.constant 0 : index
    %131 = vector.load %arg7[%c0_99, %c0_100] : memref<1x128xf32, #tpu.memory_space<vmem>>, vector<1x128xf32>
    %132 = vector.broadcast %131 : vector<1x128xf32> to vector<64x128xf32>
    %133 = arith.addf %130, %132 : vector<64x128xf32>
    %cst_101 = arith.constant 0.000000e+00 : f32
    %134 = vector.broadcast %cst_101 : f32 to vector<64x128xf32>
    %135 = arith.maximumf %133, %134 : vector<64x128xf32>
    %c0_102 = arith.constant 0 : index
    %c0_103 = arith.constant 0 : index
    %136 = vector.load %arg8[%c0_102, %c0_103] : memref<128x128xf32, #tpu.memory_space<vmem>>, vector<128x128xf32>
    %cst_104 = arith.constant dense<0.000000e+00> : vector<64x128xf32>
    %137 = tpu.matmul %135, %136, %cst_104 {dimension_numbers = #tpu.dot_dimension_numbers<[1], [0], [0], [1], [0, 0, 1, 1], [], []>} : vector<64x128xf32>, vector<128x128xf32>, vector<64x128xf32> -> vector<64x128xf32>
    %c0_105 = arith.constant 0 : index
    %c0_106 = arith.constant 0 : index
    %c0_107 = arith.constant 0 : index
    %138 = vector.load %arg9[%c0_105, %c0_106, %c0_107] : memref<1x64x128xf32, #tpu.memory_space<vmem>>, vector<1x64x128xf32>
    %139 = vector.shape_cast %138 : vector<1x64x128xf32> to vector<64x128xf32>
    %140 = vector.shape_cast %137 : vector<64x128xf32> to vector<1x64x128xf32>
    tpu.vector_store %arg9[%c0_105, %c0_106, %c0_107], %140 {strides = array<i32>} : memref<1x64x128xf32, #tpu.memory_space<vmem>>, vector<1x64x128xf32>,
    return
  }
  func.func @transform_0(%arg0: i32) -> (i32, i32, i32) {
    %c0_i32 = arith.constant 0 : i32
    %c0_i32_0 = arith.constant 0 : i32
    %c0_i32_1 = arith.constant 0 : i32
    return %arg0, %c0_i32, %c0_i32_0 : i32, i32, i32
  }
  func.func @transform_1(%arg0: i32) -> (i32, i32) {
    %c0_i32 = arith.constant 0 : i32
    %c0_i32_0 = arith.constant 0 : i32
    %c0_i32_1 = arith.constant 0 : i32
    return %c0_i32, %c0_i32_0 : i32, i32
  }
  func.func @transform_2(%arg0: i32) -> (i32, i32) {
    %c0_i32 = arith.constant 0 : i32
    %c0_i32_0 = arith.constant 0 : i32
    %c0_i32_1 = arith.constant 0 : i32
    return %c0_i32, %c0_i32_0 : i32, i32
  }
  func.func @transform_3(%arg0: i32) -> (i32, i32) {
    %c0_i32 = arith.constant 0 : i32
    %c0_i32_0 = arith.constant 0 : i32
    %c0_i32_1 = arith.constant 0 : i32
    return %c0_i32, %c0_i32_0 : i32, i32
  }
  func.func @transform_4(%arg0: i32) -> (i32, i32) {
    %c0_i32 = arith.constant 0 : i32
    %c0_i32_0 = arith.constant 0 : i32
    %c0_i32_1 = arith.constant 0 : i32
    return %c0_i32, %c0_i32_0 : i32, i32
  }
  func.func @transform_5(%arg0: i32) -> (i32, i32) {
    %c0_i32 = arith.constant 0 : i32
    %c0_i32_0 = arith.constant 0 : i32
    %c0_i32_1 = arith.constant 0 : i32
    return %c0_i32, %c0_i32_0 : i32, i32
  }
  func.func @transform_6(%arg0: i32) -> (i32, i32) {
    %c0_i32 = arith.constant 0 : i32
    %c0_i32_0 = arith.constant 0 : i32
    %c0_i32_1 = arith.constant 0 : i32
    return %c0_i32, %c0_i32_0 : i32, i32
  }
  func.func @transform_7(%arg0: i32) -> (i32, i32) {
    %c0_i32 = arith.constant 0 : i32
    %c0_i32_0 = arith.constant 0 : i32
    %c0_i32_1 = arith.constant 0 : i32
    return %c0_i32, %c0_i32_0 : i32, i32
  }
  func.func @transform_8(%arg0: i32) -> (i32, i32, i32) {
    %c0_i32 = arith.constant 0 : i32
    %c0_i32_0 = arith.constant 0 : i32
    %c0_i32_1 = arith.constant 0 : i32
    return %arg0, %c0_i32, %c0_i32_0 : i32, i32, i32
  }
}

</mosaic_0001>

<bundles_post_ra>
// kernel: tpu_custom_call.1
= control target key start
LH: loop header
LB: loop body
LE: loop exit
PB: predicated region body
PF: predicated region fallthrough
CT: control target
= control target key end

     0   :  { %s2003_s0 = inlined_call_operand.hbm [shape: f32[2,8,256], index: 0, kind: input, shape index: {}]   ;;  %s2004_s1 = inlined_call_operand.vmem [shape: f32[8,1], index: 1, kind: input, shape index: {}]   ;;  %s2005_s2 = inlined_call_operand.vmem [shape: f32[8,1], index: 2, kind: input, shape index: {}]   ;;  %s2006_s3 = inlined_call_operand.hbm [shape: f32[8,128], index: 3, kind: input, shape index: {}]   ;;  %s2007_s4 = inlined_call_operand.vmem [shape: f32[1,128], index: 4, kind: input, shape index: {}]   ;;  %s2008_s5 = inlined_call_operand.vmem [shape: f32[9,128], index: 5, kind: input, shape index: {}]   ;;  %s2009_s6 = inlined_call_operand.vmem [shape: f32[1,128], index: 6, kind: input, shape index: {}]   ;;  %s2010_s7 = inlined_call_operand.hbm [shape: f32[128,128], index: 7, kind: input, shape index: {}]   ;;  %s2011_s8 = inlined_call_operand.hbm [shape: f32[2,64,128], index: 8, kind: output, shape index: {}]  }
   0x1   :  { %2012 = sst [smem:[#allocation14_spill]] %s2006_s3 }
   0x2   :  { %2013 = sst [smem:[#allocation15_spill]] %s2010_s7 }
   0x3   :  { %13 = vsyncpa [#allocation5], 0 }
   0x4   :  { %15 = vsyncpa [#allocation5 + $0x1], 0 }
   0x5   :  { %16 = vsyncpa [#allocation8], 0 }
   0x6   :  { %17 = vsyncpa [#allocation6], 0 }
   0x7   :  { %19 = vsyncpa [#allocation6 + $0x1], 0  ;;  %s1568_s27 = smov 0   ;;  %s1570_s28 = smov 0  }
   0x8   :  { %s1572_s29 = smov 0   ;;  %s1574_s30 = smov 0  }
   0x9 LB: > { %s1589_s9 = sadd.s32 4294967295, %s1514_s30   ;;  %s1223_s10 = sadd.s32 4294967294, %s1514_s30   ;;  %s1514_s30 = sphi %s1574_s30, %s2025_s30   ;;  %s1510_s29 = sphi %s1572_s29, %s2024_s29   ;;  %s1506_s28 = sphi %s1570_s28, %s2023_s28   ;;  %s1502_s27 = sphi %s1568_s27, %s2022_s27  }
   0xa   : > { %p45_p0 = scmp.ne.s32.totalorder %s1506_s28, %s1502_s27  ;;  %p46_p1 = scmp.eq.s32.totalorder %s1589_s9, 0 }
   0xb   : > { %p216_p2 = scmp.eq.s32.totalorder %s1589_s9, 1  ;;  %p222_p3 = scmp.eq.s32.totalorder %s1223_s10, 1 }
   0xc   : > { %p1598_p4 = por %p46_p1, %p45_p0  ;;  %p1224_p5 = scmp.ge.s32.totalorder %s1514_s30, 1 }
   0xd   : > { %p1603_p6 = por %p222_p3, %p45_p0  ;;  %p229_p7 = scmp.lt.s32.totalorder %s1514_s30, 3 }
   0xe   : > { %s2016_s3 = sld [smem:[#allocation14_spill]]  ;;  %s1516_s17 = smov [#allocation7]  }
   0xf   : > { %p1611_p8 = pnand %p1224_p5, %p229_p7  ;;  %s249_s18 = sshll.u32 %s1516_s17, 4  ;;  %s250_s18 = int_to_ptr.vmem [resolvable:$true] %s249_s18 }
  0x10   : > { %s2018_s7 = sld [smem:[#allocation15_spill]]  ;;  %s1517_s22 = smov [#allocation9]  }
  0x11   : > { %p1289_p10 = pneg %p1611_p8  ;;  %s269_s23 = sshll.u32 %s1517_s22, 4  ;;  %s270_s23 = int_to_ptr.vmem [resolvable:$true] %s269_s23 }
  0x12   : > { %s1518_s24 = smov 128   ;;  %s1519_s25 = smov 8  }
  0x13   : > { %p1290_p11 = pnand %p1289_p10, %p46_p1  ;;  %s1624_s26 = sadd.s32 1, %s1514_s30  }
  0x14   : > { %s247_s15 = sshll.u32 %s2016_s3, 4  ;;  %s29_s10 = ssub.s32 %s1514_s30, %s1624_s26  ;;  %s248_s15 = int_to_ptr.hbm [resolvable:$true] %s247_s15 }
  0x15   : > { %1292 = dma.hbm_to_vmem [thread:$0]  (!%p1290_p11), %s248_s15, 128, %s250_s18, [#allocation8]  }
  0x16   : > { %s267_s21 = sshll.u32 %s2018_s7, 4  ;;  %p30_p12 = scmp.eq.s32.totalorder %s29_s10, 0  ;;  %s268_s21 = int_to_ptr.hbm [resolvable:$true] %s267_s21 }
  0x17   : > { %1295 = dma.hbm_to_vmem [thread:$0]  (!%p1290_p11), %s268_s21, 2048, %s270_s23, [#allocation8], %s1518_s24, %s1518_s24, %s1519_s25  }
  0x18   : > { %s32_s13 = sadd.s32 1, %s1510_s29  ;;  %p39_p13 = scmp.ne.s32.totalorder %s1510_s29, %s1506_s28 }
  0x19   : > { %p40_p0 = scmp.eq.s32.totalorder %s1514_s30, 0  ;;  %p1306_p7 = scmp.lt.s32.totalorder %s1514_s30, 2 }
  0x1a   : > { %s1633_s14 = scalar_select %p30_p12, %s1510_s29, %s32_s13  }
  0x1b   : > { %p41_p3 = por %p40_p0, %p39_p13  ;;  %p1637_p5 = por %p216_p2, %p39_p13 }
  0x1c   : > { %s283_s15 = sand.u32 1, %s1510_s29   ;;  %s1273_s19 = sshll.u32 %s1514_s30, 4 }
  0x1d   : > { %s1228_s18 = sshll.u32 %s283_s15, 4  ;;  %s292_s22 = scalar_lea.hbm %s2003_s0, %s1273_s19 }
  0x1e   : > { %s287_s23 = scalar_lea.vmem [#allocation4], %s1228_s18  ;;  %s294_s25 = sshll.u32 %s292_s22, 4  ;;  %s295_s25 = int_to_ptr.hbm [resolvable:$true] %s294_s25 }
  0x1f   : > { %s296_s24 = sshll.u32 %s287_s23, 4  ;;  %p1647_p10 = pnand %p1306_p7, %p41_p3  ;;  %s297_s24 = int_to_ptr.vmem [resolvable:$true] %s296_s24 }
  0x20   : > { %s284_s13 = scalar_lea.sflag [#allocation5], %s283_s15  ;;  %s1414_s3 = sshra.s32 %s295_s25, 4  ;;  %s1415_s3 = int_to_ptr.hbm [resolvable:$true] %s1414_s3 }
  0x21   : > { %s1416_s7 = scalar_lea.hbm %s1415_s3, 16  ;;  %p1418_p11 = pneg %p1647_p10 }
  0x22   : > { %p1417_p2 = scmp.ne.s32.totalorder %s1415_s3, %s1416_s7  ;;  %s1421_s20 = scalar_lea.hbm %s2003_s0, 32 }
  0x23   : > { %p1422_p0 = scmp.lt.s32.totalorder %s1415_s3, %s2003_s0  ;;  %p1423_p3 = scmp.lt.s32.totalorder %s1421_s20, %s1416_s7 }
  0x24   : > { %p1419_p12 = pnand %p1418_p11, %p1417_p2 }
  0x25   : > { %p1424_p7 = por %p1423_p3, %p1422_p0 }
  0x26   : > { %p1420_p13 = pneg %p1419_p12 }
  0x28   : > { %p1425_p9 = pnand %p1424_p7, %p1420_p13 }
  0x2a   : > { %1428 = shalt.err (!%p1425_p9)
}
  0x2b   : > { %1299 = dma.hbm_to_vmem [thread:$0]  (!%p1647_p10), %s295_s25, 256, %s297_s24, %s284_s13  }
  0x2c   : > { %305 = sbr.rel (%p1611_p8) target bundleno = 875 (0x36b), region = 52  ;;  %s1664_s15 = sand.u32 (!%p1611_p8), 1, %s1506_s28  }
  0x2d   : > { %s1232_s23 = sshll.u32 (!%p1611_p8), %s1664_s15, 4  ;;  %s308_s19 = scalar_lea.sflag (!%p1611_p8), [#allocation5], %s1664_s15 }
  0x2e   : > { %s311_s18 = scalar_lea.vmem (!%p1611_p8), [#allocation4], %s1232_s23 }
  0x31   : > { %1489 = dma.done.wait (%p1598_p4), %s308_s19, 256  }
  0x32   : > { %1491 = vsyncadd (%p1598_p4), %s308_s19, 4294967040 }
  0x33   : > { %1493 = dma.done.wait (%p46_p1), [#allocation8], 2176  }
  0x34   : > { %1495 = vsyncadd (%p46_p1), [#allocation8], 4294965120  ;;  %v1520_v0 = vmov 0   ;;  %v363_v1 = vld [vmem:[%s2004_s1] sm:$0xff]  ;;  %v362_v5 = vld [vmem:[%s311_s18 + $0x8] sm:$0xff]  ;;  %vm450_vm0 = vcmask 64512  }
  0x35   : > { %1350 = vset.pattern.permute.xlu0 %v1520_v0  ;;  %v371_v2 = vld [vmem:[%s2005_s2] sm:$0xff]  ;;  %v1064_v56 = vld [vmem:[#allocation9 + $0x70] sm:$0xff]  ;;  %v1063_v58 = vld [vmem:[#allocation9 + $0x68] sm:$0xff]  ;;  %vm734_vm1 = vcmask 1040384   ;;  %s1235_s19 = sshll.u32 %s1664_s15, 6  ;;  %s1274_s3 = sshll.u32 %s1589_s9, 6 }
  0x36   : > { %366 = vperm.xlu0 %1350, %v363_v1   ;;  %v361_v4 = vld [vmem:[%s311_s18] sm:$0xff]  ;;  %v1062_v59 = vld [vmem:[#allocation9 + $0x60] sm:$0xff]  ;;  %v1060_v61 = vld [vmem:[#allocation9 + $0x50] sm:$0xff]  ;;  %s354_s18 = scalar_lea.vmem [#allocation10], %s1235_s19  ;;  %s1127_s24 = scalar_lea.hbm %s2011_s8, %s1274_s3 }
  0x37   : > { %v381_v12 = vld [vmem:[#allocation7] sm:$0xff]  ;;  %v1059_v63 = vld [vmem:[#allocation9 + $0x48] sm:$0xff]  ;;  %v1058_v1 = vld [vmem:[#allocation9 + $0x40] sm:$0xff]  ;;  %s1128_s11 = sshll.u32 %s354_s18, 4  ;;  %s1130_s25 = sshll.u32 %s1127_s24, 4  ;;  %s1129_s11 = int_to_ptr.vmem [resolvable:$true] %s1128_s11  ;;  %s1131_s25 = int_to_ptr.hbm [resolvable:$true] %s1130_s25 }
  0x38   : > { %562 = vmatpush.msra.mxu0 %v381_v12  ;;  %1275 = vmatpush.msra.mxu2 %v381_v12  ;;  %v1065_v55 = vld [vmem:[#allocation9 + $0x78] sm:$0xff]  ;;  %s1116_s10 = scalar_lea.sflag [#allocation6], %s1664_s15  ;;  %s1458_s13 = sshra.s32 %s1131_s25, 4  ;;  %s1459_s13 = int_to_ptr.hbm [resolvable:$true] %s1458_s13 }
  0x39   : > { %1276 = vmatpush.msra.mxu3 %v381_v12  ;;  %1066 = vmatpush.msra.mxu1 %v1065_v55  ;;  %v1061_v60 = vld [vmem:[#allocation9 + $0x58] sm:$0xff]  ;;  %v1051_v12 = vld [vmem:[#allocation9 + $0x8] sm:$0xff]  ;;  %s1460_s20 = scalar_lea.hbm %s1459_s13, 64  ;;  %s1464_s22 = scalar_lea.hbm %s2011_s8, 128 }
  0x3a   : > { %p1461_p1 = scmp.ne.s32.totalorder %s1459_s13, %s1460_s20  ;;  %p1465_p9 = scmp.lt.s32.totalorder %s1459_s13, %s2011_s8 }
  0x3b   : > { %1067 = vmatpush.msra.mxu1 %v1064_v56  ;;  %p1466_p10 = scmp.lt.s32.totalorder %s1464_s22, %s1460_s20 }
  0x3c   : > { %p1462_p4 = pnand %p1461_p1, %p1637_p5 }
  0x3d   : > { %1068 = vmatpush.msra.mxu1 %v1063_v58  ;;  %p1467_p2 = por %p1466_p10, %p1465_p9 }
  0x3e   : > { %374 = vperm.xlu0 %1350, %v371_v2   ;;  %v1057_v2 = vld [vmem:[#allocation9 + $0x38] sm:$0xff]  ;;  %p1463_p8 = pneg %p1462_p4 }
  0x3f   : > { %1069 = vmatpush.msra.mxu1 %v1062_v59 }
  0x40   : > { %p1468_p11 = pnand %p1467_p2, %p1463_p8 }
  0x41   : > { %1070 = vmatpush.msra.mxu1 %v1061_v60 }
  0x43   : > { %1071 = vmatpush.msra.mxu1 %v1060_v61 }
  0x45   : > { %1072 = vmatpush.msra.mxu1 %v1059_v63 }
  0x47   : > { %1073 = vmatpush.msra.mxu1 %v1058_v1 }
  0x49   : > { %1074 = vmatpush.msra.mxu1 %v1057_v2 }
  0xa8   : > { %v367_v3 = vpop.permute.xlu0 %366 }
  0xa9   : > { %v369_v6 = vmul.f32 %v367_v3, %v361_v4  ;;  %v370_v7 = vmul.f32 %v367_v3, %v362_v5  ;;  %v1056_v3 = vld [vmem:[#allocation9 + $0x30] sm:$0xff]  ;;  %v1055_v5 = vld [vmem:[#allocation9 + $0x28] sm:$0xff] }
  0xaa   : > { %1075 = vmatpush.msra.mxu1 %v1056_v3 }
  0xac   : > { %1076 = vmatpush.msra.mxu1 %v1055_v5 }
  0xb0   : > { %v375_v8 = vpop.permute.xlu0 %374 }
  0xb1   : > { %v378_v9 = vadd.f32 %v375_v8, %v370_v7  ;;  %v377_v10 = vadd.f32 %v375_v8, %v369_v6  ;;  %v1054_v6 = vld [vmem:[#allocation9 + $0x20] sm:$0xff]  ;;  %v1053_v8 = vld [vmem:[#allocation9 + $0x18] sm:$0xff] }
  0xb2   : > { %1077 = vmatpush.msra.mxu1 %v1054_v6  ;;  %v1797_v6 = vld [vmem:[%s2008_s5 + $0x8] ss:$0 sm:$0xff] }
  0xb3   : > { %v379_v11 = vmax.f32 %v377_v10, 0.0  ;;  %v380_v13 = vmax.f32 %v378_v9, 0.0  ;;  %v1052_v9 = vld [vmem:[#allocation9 + $0x10] sm:$0xff]  ;;  %v1741_v10 = vld [vmem:[%s2007_s4] ss:$0 sm:$0xff] }
  0xb4   : > { %1078 = vmatpush.msra.mxu1 %v1053_v8 }
  0xb5   : > { %386 = vxpose.xlu1.b32.start.end [1/1] (short) %v379_v11, 128 }
  0xb6   : > { %1079 = vmatpush.msra.mxu1 %v1052_v9 }
  0xb8   : > { %1080 = vmatpush.msra.mxu1 %v1051_v12 }
 0x135   : > { %418 = vxpose.xlu1.b32.start.end [1/1] (short) %v380_v13, 128 }
 0x159   : > { %v402_v14 = vpop.trf.xlu1 }
 0x15a   : > { %1236 = vmatmul.msk.f32.vlgmr.msra.gmra.mxu0 %vm450_vm0, %v402_v14 }
 0x161   : > { %v403_v15 = vpop.trf.xlu1 }
 0x162   : > { %1237 = vmatmul.msk.f32.gmra.mxu0 %vm450_vm0, %v403_v15  ;;  %v1050_v15 = vld [vmem:[#allocation9] sm:$0xff] }
 0x163   : > { %1081 = vmatpush.msra.mxu1 %v1050_v15 }
 0x169   : > { %v404_v16 = vpop.trf.xlu1 }
 0x16a   : > { %1238 = vmatmul.msk.f32.gmra.mxu0 %vm450_vm0, %v404_v16 }
 0x171   : > { %v405_v17 = vpop.trf.xlu1 }
 0x172   : > { %1239 = vmatmul.msk.f32.gmra.mxu0 %vm450_vm0, %v405_v17 }
 0x179   : > { %v406_v18 = vpop.trf.xlu1 }
 0x17a   : > { %1240 = vmatmul.msk.f32.gmra.mxu0 %vm450_vm0, %v406_v18 }
 0x181   : > { %v407_v19 = vpop.trf.xlu1 }
 0x182   : > { %1241 = vmatmul.msk.f32.gmra.mxu0 %vm450_vm0, %v407_v19 }
 0x189   : > { %v408_v20 = vpop.trf.xlu1 }
 0x18a   : > { %1242 = vmatmul.msk.f32.gmra.mxu0 %vm450_vm0, %v408_v20 }
 0x191   : > { %v409_v21 = vpop.trf.xlu1 }
 0x192   : > { %1243 = vmatmul.msk.f32.gmra.mxu0 %vm450_vm0, %v409_v21  ;;  %v811_v21 = vld [vmem:[%s2008_s5] sm:$0xff] }
 0x193   : > { %v1781_v58 = vperm.slane %v811_v21, 7  ;;  %v1783_v59 = vperm.slane %v811_v21, 6 }
 0x199   : > { %v410_v22 = vpop.trf.xlu1 }
 0x19a   : > { %1244 = vmatmul.msk.f32.gmra.mxu0 %vm450_vm0, %v410_v22 }
 0x1a1   : > { %v411_v23 = vpop.trf.xlu1 }
 0x1a2   : > { %1245 = vmatmul.msk.f32.gmra.mxu0 %vm450_vm0, %v411_v23  ;;  %v1755_v23 = vperm.slane %v811_v21, 1 }
 0x1a9   : > { %v412_v24 = vpop.trf.xlu1 }
 0x1aa   : > { %1246 = vmatmul.msk.f32.gmra.mxu0 %vm450_vm0, %v412_v24  ;;  %v1757_v24 = vperm.slane %v811_v21, 0 }
 0x1b1   : > { %v413_v25 = vpop.trf.xlu1 }
 0x1b2   : > { %1247 = vmatmul.msk.f32.vlgmr.msra.gmra.mxu2 %vm450_vm0, %v413_v25  ;;  %v1759_v25 = vperm.slane %v811_v21, 3 }
 0x1b9   : > { %v414_v26 = vpop.trf.xlu1 }
 0x1ba   : > { %1248 = vmatmul.msk.f32.gmra.mxu2 %vm450_vm0, %v414_v26 }
 0x1c1   : > { %v415_v27 = vpop.trf.xlu1 }
 0x1c2   : > { %1249 = vmatmul.msk.f32.gmra.mxu2 %vm450_vm0, %v415_v27 }
 0x1c9   : > { %v416_v28 = vpop.trf.xlu1 }
 0x1ca   : > { %1250 = vmatmul.msk.f32.gmra.mxu2 %vm450_vm0, %v416_v28 }
 0x1d1   : > { %v417_v29 = vpop.trf.xlu1 }
 0x1d2   : > { %1251 = vmatmul.msk.f32.gmra.mxu2 %vm450_vm0, %v417_v29  ;;  %v1762_v29 = vperm.slane %v811_v21, 4 }
 0x1d7   : > { %v564_v42 = vpop.f32.mrf.mxu0 }
 0x1d8   : > { %v565_v20 = vadd.f32 %v1741_v10, %v564_v42 }
 0x1d9   : > { %v434_v30 = vpop.trf.xlu1 }
 0x1da   : > { %1252 = vmatmul.msk.f32.gmra.mxu2 %vm450_vm0, %v434_v30  ;;  %v660_v28 = vmax.f32 %v565_v20, 0.0 }
 0x1df   : > { %v1711_v45 = vpop.f32.mrf.mxu0 }
 0x1e1   : > { %v435_v31 = vpop.trf.xlu1 }
 0x1e2   : > { %1253 = vmatmul.msk.f32.gmra.mxu2 %vm450_vm0, %v435_v31 }
 0x1e7   : > { %v1715_v47 = vpop.f32.mrf.mxu0 }
 0x1e8   : > { %v571_v63 = vadd.f32 %v1741_v10, %v1715_v47 }
 0x1e9   : > { %v436_v32 = vpop.trf.xlu1 }
 0x1ea   : > { %1254 = vmatmul.msk.f32.gmra.mxu2 %vm450_vm0, %v436_v32  ;;  %v1765_v32 = vperm.slane %v811_v21, 2 }
 0x1ef   : > { %v1718_v49 = vpop.f32.mrf.mxu0 }
 0x1f1   : > { %v437_v33 = vpop.trf.xlu1 }
 0x1f2   : > { %1255 = vmatmul.msk.f32.gmra.mxu2 %vm450_vm0, %v437_v33  ;;  %v822_v33 = vmul.f32 0.0, %v1757_v24 }
 0x1f7   : > { %v1722_v51 = vpop.f32.mrf.mxu0 }
 0x1f9   : > { %v438_v34 = vpop.trf.xlu1 }
 0x1fa   : > { %1256 = vmatmul.msk.f32.gmra.mxu2 %vm450_vm0, %v438_v34  ;;  %v839_v34 = vmul.f32 0.0, %v1755_v23 }
 0x1ff   : > { %v1726_v53 = vpop.f32.mrf.mxu0 }
 0x201   : > { %v439_v35 = vpop.trf.xlu1 }
 0x202   : > { %1257 = vmatmul.msk.f32.gmra.mxu2 %vm450_vm0, %v439_v35 }
 0x207   : > { %v1730_v57 = vpop.f32.mrf.mxu0 }
 0x209   : > { %v440_v36 = vpop.trf.xlu1 }
 0x20a   : > { %1258 = vmatmul.msk.f32.vlgmr.msra.gmra.mxu3 %vm450_vm0, %v440_v36 }
 0x20f   : > { %v1734_v0 = vpop.f32.mrf.mxu0 }
 0x211   : > { %v441_v37 = vpop.trf.xlu1 }
 0x212   : > { %1259 = vmatmul.msk.f32.gmra.mxu3 %vm450_vm0, %v441_v37 }
 0x217   : > { %v588_v7 = vpop.f32.mrf.mxu0 }
 0x218   : > { %v589_v13 = vadd.f32 %v1741_v10, %v588_v7 }
 0x219   : > { %v442_v38 = vpop.trf.xlu1 }
 0x21a   : > { %1260 = vmatmul.msk.f32.gmra.mxu3 %vm450_vm0, %v442_v38  ;;  %v668_v16 = vmax.f32 %v589_v13, 0.0  ;;  %v568_v38 = vadd.f32 %v1741_v10, %v1711_v45 }
 0x21c   : > { %v718_v19 = vrot.slane %v668_v16, 7  ;;  %v661_v45 = vmax.f32 %v568_v38, 0.0  ;;  %v1821_v38 = vadd.f32 %v1741_v10, %v1722_v51 }
 0x21e   : > { %v735_v27 = vsel %vm734_vm1, 0.0, %v718_v19 }
 0x21f   : > { %v591_v17 = vpop.f32.mrf.mxu0  ;;  %v889_v35 = vmul.f32 %v1759_v25, %v735_v27  ;;  %v662_v27 = vmax.f32 %v571_v63, 0.0 }
 0x220   : > { %v1753_v22 = vadd.f32 %v1741_v10, %v591_v17 }
 0x221   : > { %v443_v39 = vpop.trf.xlu1 }
 0x222   : > { %1261 = vmatmul.msk.f32.gmra.mxu3 %vm450_vm0, %v443_v39  ;;  %v669_v30 = vmax.f32 %v1753_v22, 0.0 }
 0x224   : > { %v719_v42 = vrot.slane %v669_v30, 7 }
 0x226   : > { %v736_v2 = vsel %vm734_vm1, 0.0, %v719_v42 }
 0x227   : > { %v594_v31 = vpop.f32.mrf.mxu0 }
 0x229   : > { %v444_v40 = vpop.trf.xlu1 }
 0x22a   : > { %1262 = vmatmul.msk.f32.gmra.mxu3 %vm450_vm0, %v444_v40  ;;  %v906_v40 = vmul.f32 %v1762_v29, %v660_v28 }
 0x22c   : > { %v914_v55 = vadd.f32 %v906_v40, %v889_v35 }
 0x231   : > { %v445_v41 = vpop.trf.xlu1 }
 0x232   : > { %1263 = vmatmul.msk.f32.gmra.mxu3 %vm450_vm0, %v445_v41  ;;  %v1775_v41 = vperm.slane %v811_v21, 5 }
 0x234   : > { %v931_v1 = vmul.f32 %v1775_v41, %v668_v16  ;;  %v890_v16 = vmul.f32 %v1759_v25, %v736_v2 }
 0x235   : > { %v1720_v50 = vpop.f32.mrf.mxu2 }
 0x236   : > { %v1787_v60 = vadd.f32 %v1741_v10, %v1720_v50  ;;  %v574_v50 = vadd.f32 %v1741_v10, %v1718_v49  ;;  %v939_v9 = vadd.f32 %v931_v1, %v914_v55 }
 0x238   : > { %v671_v17 = vmax.f32 %v1787_v60, 0.0 }
 0x239   : > { %v446_v43 = vpop.trf.xlu1 }
 0x23a   : > { %1264 = vmatmul.msk.f32.gmra.mxu3 %vm450_vm0, %v446_v43  ;;  %v1778_v43 = vadd.f32 %v1741_v10, %v594_v31  ;;  %v721_v40 = vrot.slane %v671_v17, 7 }
 0x23c   : > { %v670_v3 = vmax.f32 %v1778_v43, 0.0 }
 0x23d   : > { %v1724_v52 = vpop.f32.mrf.mxu2 }
 0x23e   : > { %v720_v49 = vrot.slane %v670_v3, 7 }
 0x241   : > { %v447_v44 = vpop.trf.xlu1 }
 0x242   : > { %1265 = vmatmul.msk.f32.gmra.mxu3 %vm450_vm0, %v447_v44 }
 0x245   : > { %v1728_v54 = vpop.f32.mrf.mxu2 }
 0x249   : > { %v448_v46 = vpop.trf.xlu1 }
 0x24a   : > { %1266 = vmatmul.msk.f32.gmra.mxu3 %vm450_vm0, %v448_v46  ;;  %v847_v46 = vadd.f32 %v839_v34, %v822_v33  ;;  %v663_v33 = vmax.f32 %v574_v50, 0.0 }
 0x24d   : > { %v1732_v62 = vpop.f32.mrf.mxu2 }
 0x251   : > { %v449_v48 = vpop.trf.xlu1 }
 0x252   : > { %1267 = vmatmul.msk.f32.gmra.mxu3 %vm450_vm0, %v449_v48  ;;  %v864_v48 = vmul.f32 0.0, %v1765_v32 }
 0x254   : > { %v872_v47 = vadd.f32 %v864_v48, %v847_v46  ;;  %v932_v46 = vmul.f32 %v1775_v41, %v669_v30  ;;  %v737_v48 = vsel %vm734_vm1, 0.0, %v720_v49 }
 0x255   : > { %v1736_v4 = vpop.f32.mrf.mxu2 }
 0x25d   : > { %v612_v14 = vpop.f32.mrf.mxu2 }
 0x25e   : > { %v613_v36 = vadd.f32 %v1741_v10, %v612_v14 }
 0x260   : > { %v676_v56 = vmax.f32 %v613_v36, 0.0  ;;  %v1014_v36 = vadd.f32 %v939_v9, %v872_v47  ;;  %v891_v47 = vmul.f32 %v1759_v25, %v737_v48 }
 0x262   : > { %v973_v12 = vmul.f32 %v1781_v58, %v676_v56  ;;  %v840_v20 = vmul.f32 %v1755_v23, %v676_v56 }
 0x265   : > { %v615_v26 = vpop.f32.mrf.mxu2 }
 0x266   : > { %v616_v7 = vadd.f32 %v1741_v10, %v615_v26  ;;  %v907_v26 = vmul.f32 %v1762_v29, %v661_v45  ;;  %v1830_v45 = vadd.f32 %v1741_v10, %v1724_v52  ;;  %v738_v52 = vsel %vm734_vm1, 0.0, %v721_v40 }
 0x268   : > { %v677_v28 = vmax.f32 %v616_v7, 0.0 }
 0x26d   : > { %v618_v5 = vpop.f32.mrf.mxu2 }
 0x26e   : > { %v619_v51 = vadd.f32 %v1741_v10, %v618_v5  ;;  %v841_v5 = vmul.f32 %v1755_v23, %v677_v28 }
 0x275   : > { %v621_v1 = vpop.f32.mrf.mxu2 }
 0x28d   : > { %v1743_v11 = vpop.f32.mrf.mxu3 }
 0x295   : > { %v1746_v18 = vpop.f32.mrf.mxu3 }
 0x29d   : > { %v636_v37 = vpop.f32.mrf.mxu3 }
 0x29e   : > { %v637_v39 = vadd.f32 %v1741_v10, %v636_v37  ;;  %v1817_v37 = vld [vmem:[%s2009_s6] ss:$0 sm:$0xff] }
 0x2a0   : > { %v684_v44 = vmax.f32 %v637_v39, 0.0  ;;  %v915_v39 = vadd.f32 %v907_v26, %v890_v16  ;;  %v672_v16 = vmax.f32 %v1830_v45, 0.0  ;;  %v909_v26 = vmul.f32 %v1762_v29, %v663_v33 }
 0x2a1   : > { %v622_v33 = vadd.f32 %v1741_v10, %v621_v1 }
 0x2a2   : > { %v778_v61 = vrot.slane %v684_v44, 7  ;;  %v998_v21 = vmul.f32 %v1797_v6, %v684_v44  ;;  %v865_v55 = vmul.f32 %v1765_v32, %v684_v44 }
 0x2a4   : > { %v794_v8 = vsel %vm734_vm1, 0.0, %v778_v61  ;;  %v974_v61 = vmul.f32 %v1781_v58, %v677_v28 }
 0x2a5   : > { %v823_v13 = vmul.f32 %v1757_v24, %v794_v8  ;;  %v956_v14 = vmul.f32 %v1783_v59, %v794_v8  ;;  %v639_v15 = vpop.f32.mrf.mxu3  ;;  %v940_v8 = vadd.f32 %v932_v46, %v915_v39 }
 0x2a6   : > { %v640_v19 = vadd.f32 %v1741_v10, %v639_v15  ;;  %v908_v15 = vmul.f32 %v1762_v29, %v662_v27  ;;  %v933_v27 = vmul.f32 %v1775_v41, %v670_v3 }
 0x2a7   : > { %v981_v22 = vadd.f32 %v973_v12, %v956_v14  ;;  %v848_v34 = vadd.f32 %v840_v20, %v823_v13 }
 0x2a8   : > { %v685_v31 = vmax.f32 %v640_v19, 0.0  ;;  %v678_v19 = vmax.f32 %v619_v51, 0.0  ;;  %v1862_v51 = vadd.f32 %v1741_v10, %v1728_v54 }
 0x2a9   : > { %v1006_v35 = vadd.f32 %v998_v21, %v981_v22  ;;  %v873_v2 = vadd.f32 %v865_v55, %v848_v34  ;;  %v916_v34 = vadd.f32 %v908_v15, %v891_v47  ;;  %v580_v15 = vadd.f32 %v1741_v10, %v1726_v53 }
 0x2aa   : > { %v779_v42 = vrot.slane %v685_v31, 7  ;;  %v999_v12 = vmul.f32 %v1797_v6, %v685_v31  ;;  %v866_v39 = vmul.f32 %v1765_v32, %v685_v31  ;;  %v975_v46 = vmul.f32 %v1781_v58, %v678_v19 }
 0x2ab   : > { %v1022_v56 = vadd.f32 %v1014_v36, %v1006_v35  ;;  %v1015_v22 = vadd.f32 %v940_v8, %v873_v2  ;;  %v892_v35 = vmul.f32 %v1759_v25, %v738_v52  ;;  %v664_v36 = vmax.f32 %v1821_v38, 0.0  ;;  %v624_v2 = vpop.f32.mrf.mxu2 }
 0x2ac   : > { %v795_v63 = vsel %vm734_vm1, 0.0, %v779_v42  ;;  %v722_v42 = vrot.slane %v672_v16, 7  ;;  %v842_v1 = vmul.f32 %v1755_v23, %v678_v19  ;;  %v679_v8 = vmax.f32 %v622_v33, 0.0 }
 0x2ad   : > { %v824_v50 = vmul.f32 %v1757_v24, %v795_v63  ;;  %v957_v30 = vmul.f32 %v1783_v59, %v795_v63  ;;  %v642_v7 = vpop.f32.mrf.mxu3  ;;  %v1034_v44 = vadd.f32 %v1817_v37, %v1022_v56  ;;  %v917_v31 = vadd.f32 %v909_v26, %v892_v35 }
 0x2ae   : > { %v643_v9 = vadd.f32 %v1741_v10, %v642_v7  ;;  %v739_v52 = vsel %vm734_vm1, 0.0, %v722_v42  ;;  %v843_v42 = vmul.f32 %v1755_v23, %v679_v8 }
 0x2af   : > { %v1042_v13 = vmax.f32 %v1034_v44, 0.0  ;;  %v982_v14 = vadd.f32 %v974_v61, %v957_v30  ;;  %v849_v20 = vadd.f32 %v841_v5, %v824_v50  ;;  %v941_v61 = vadd.f32 %v933_v27, %v916_v34 }
 0x2b0   : > { %v686_v49 = vmax.f32 %v643_v9, 0.0  ;;  %v934_v44 = vmul.f32 %v1775_v41, %v671_v17  ;;  %v1887_v27 = vadd.f32 %v1741_v10, %v1732_v62  ;;  %v1898_v62 = vadd.f32 %v1741_v10, %v1730_v57 }
 0x2b1   : > { %1082 = vmatmul.f32.vlgmr.msra.gmra.mxu1 %v1042_v13  ;;  %v1007_v21 = vadd.f32 %v999_v12, %v982_v14  ;;  %v874_v55 = vadd.f32 %v866_v39, %v849_v20  ;;  %v910_v12 = vmul.f32 %v1762_v29, %v664_v36  ;;  %v673_v13 = vmax.f32 %v1862_v51, 0.0 }
 0x2b2   : > { %v780_v28 = vrot.slane %v686_v49, 7  ;;  %v1000_v50 = vmul.f32 %v1797_v6, %v686_v49  ;;  %v942_v19 = vadd.f32 %v934_v44, %v917_v31  ;;  %v867_v60 = vmul.f32 %v1765_v32, %v686_v49 }
 0x2b3   : > { %v1023_v40 = vadd.f32 %v1015_v22, %v1007_v21  ;;  %v1016_v5 = vadd.f32 %v941_v61, %v874_v55  ;;  %v893_v20 = vmul.f32 %v1759_v25, %v739_v52  ;;  %v976_v21 = vmul.f32 %v1781_v58, %v679_v8 }
 0x2b4   : > { %v796_v48 = vsel %vm734_vm1, 0.0, %v780_v28  ;;  %v625_v22 = vadd.f32 %v1741_v10, %v624_v2  ;;  %v723_v49 = vrot.slane %v673_v13, 7  ;;  %v1891_v39 = vadd.f32 %v1741_v10, %v1736_v4 }
 0x2b5   : > { %v825_v56 = vmul.f32 %v1757_v24, %v796_v48  ;;  %v958_v38 = vmul.f32 %v1783_v59, %v796_v48  ;;  %v645_v43 = vpop.f32.mrf.mxu3  ;;  %v1035_v3 = vadd.f32 %v1817_v37, %v1023_v40  ;;  %v665_v55 = vmax.f32 %v580_v15, 0.0 }
 0x2b6   : > { %v646_v63 = vadd.f32 %v1741_v10, %v645_v43  ;;  %v675_v2 = vmax.f32 %v1891_v39, 0.0  ;;  %v740_v57 = vsel %vm734_vm1, 0.0, %v723_v49 }
 0x2b7   : > { %v1043_v30 = vmax.f32 %v1035_v3, 0.0  ;;  %v983_v7 = vadd.f32 %v975_v46, %v958_v38  ;;  %v850_v9 = vadd.f32 %v842_v1, %v825_v56  ;;  %v918_v56 = vadd.f32 %v910_v12, %v893_v20  ;;  %v627_v3 = vpop.f32.mrf.mxu2 }
 0x2b8   : > { %v687_v47 = vmax.f32 %v646_v63, 0.0  ;;  %v680_v38 = vmax.f32 %v625_v22, 0.0  ;;  %v935_v63 = vmul.f32 %v1775_v41, %v672_v16  ;;  %v674_v1 = vmax.f32 %v1887_v27, 0.0 }
 0x2b9   : > { %1085 = vmatmul.f32.gmra.mxu1 %v1043_v30  ;;  %v1008_v54 = vadd.f32 %v1000_v50, %v983_v7  ;;  %v875_v34 = vadd.f32 %v867_v60, %v850_v9  ;;  %v586_v30 = vadd.f32 %v1741_v10, %v1734_v0  ;;  %v628_v45 = vadd.f32 %v1741_v10, %v627_v3 }
 0x2ba   : > { %v781_v14 = vrot.slane %v687_v47, 7  ;;  %v1001_v46 = vmul.f32 %v1797_v6, %v687_v47  ;;  %v868_v7 = vmul.f32 %v1765_v32, %v687_v47  ;;  %v943_v8 = vadd.f32 %v935_v63, %v918_v56 }
 0x2bb   : > { %v1024_v17 = vadd.f32 %v1016_v5, %v1008_v54  ;;  %v1017_v31 = vadd.f32 %v942_v19, %v875_v34  ;;  %v977_v52 = vmul.f32 %v1781_v58, %v680_v38  ;;  %v724_v47 = vrot.slane %v674_v1, 7 }
 0x2bc   : > { %v797_v26 = vsel %vm734_vm1, 0.0, %v781_v14  ;;  %v894_v14 = vmul.f32 %v1759_v25, %v740_v57  ;;  %v725_v15 = vrot.slane %v675_v2, 7  ;;  %v844_v60 = vmul.f32 %v1755_v23, %v680_v38 }
 0x2bd   : > { %v826_v35 = vmul.f32 %v1757_v24, %v797_v26  ;;  %v959_v28 = vmul.f32 %v1783_v59, %v797_v26  ;;  %v648_v36 = vpop.f32.mrf.mxu3  ;;  %v1036_v53 = vadd.f32 %v1817_v37, %v1024_v17  ;;  %v911_v22 = vmul.f32 %v1762_v29, %v665_v55 }
 0x2be   : > { %v649_v40 = vadd.f32 %v1741_v10, %v648_v36  ;;  %v681_v26 = vmax.f32 %v628_v45, 0.0  ;;  %v667_v49 = vmax.f32 %v586_v30, 0.0  ;;  %v936_v55 = vmul.f32 %v1775_v41, %v673_v13 }
 0x2bf   : > { %v1044_v33 = vmax.f32 %v1036_v53, 0.0  ;;  %v984_v48 = vadd.f32 %v976_v21, %v959_v28  ;;  %v851_v61 = vadd.f32 %v843_v42, %v826_v35  ;;  %v666_v53 = vmax.f32 %v1898_v62, 0.0 }
 0x2c0   : > { %v688_v43 = vmax.f32 %v649_v40, 0.0  ;;  %v919_v40 = vadd.f32 %v911_v22, %v894_v14  ;;  %v978_v38 = vmul.f32 %v1781_v58, %v681_v26  ;;  %v631_v3 = vadd.f32 %v1741_v10, %v1743_v11 }
 0x2c1   : > { %1088 = vmatmul.f32.gmra.mxu1 %v1044_v33  ;;  %v1009_v4 = vadd.f32 %v1001_v46, %v984_v48  ;;  %v876_v9 = vadd.f32 %v868_v7, %v851_v61  ;;  %v741_v46 = vsel %vm734_vm1, 0.0, %v724_v47  ;;  %v742_v33 = vsel %vm734_vm1, 0.0, %v725_v15 }
 0x2c2   : > { %v782_v50 = vrot.slane %v688_v43, 7  ;;  %v1002_v17 = vmul.f32 %v1797_v6, %v688_v43  ;;  %v869_v48 = vmul.f32 %v1765_v32, %v688_v43  ;;  %v895_v51 = vmul.f32 %v1759_v25, %v741_v46 }
 0x2c3   : > { %v1025_v44 = vadd.f32 %v1017_v31, %v1009_v4  ;;  %v1018_v36 = vadd.f32 %v943_v8, %v876_v9  ;;  %v896_v13 = vmul.f32 %v1759_v25, %v742_v33  ;;  %v845_v57 = vmul.f32 %v1755_v23, %v681_v26 }
 0x2c4   : > { %v798_v16 = vsel %vm734_vm1, 0.0, %v782_v50  ;;  %v944_v50 = vadd.f32 %v936_v55, %v919_v40  ;;  %v912_v8 = vmul.f32 %v1762_v29, %v666_v53 }
 0x2c5   : > { %v827_v54 = vmul.f32 %v1757_v24, %v798_v16  ;;  %v960_v5 = vmul.f32 %v1783_v59, %v798_v16  ;;  %v651_v12 = vpop.f32.mrf.mxu3  ;;  %v1037_v0 = vadd.f32 %v1817_v37, %v1025_v44  ;;  %v913_v16 = vmul.f32 %v1762_v29, %v667_v49 }
 0x2c6   : > { %v652_v19 = vadd.f32 %v1741_v10, %v651_v12  ;;  %v920_v12 = vadd.f32 %v912_v8, %v895_v51  ;;  %v634_v29 = vadd.f32 %v1741_v10, %v1746_v18 }
 0x2c7   : > { %v1045_v20 = vmax.f32 %v1037_v0, 0.0  ;;  %v985_v21 = vadd.f32 %v977_v52, %v960_v5  ;;  %v852_v35 = vadd.f32 %v844_v60, %v827_v54  ;;  %v682_v52 = vmax.f32 %v631_v3, 0.0 }
 0x2c8   : > { %v689_v34 = vmax.f32 %v652_v19, 0.0  ;;  %v937_v0 = vmul.f32 %v1775_v41, %v674_v1  ;;  %v921_v14 = vadd.f32 %v913_v16, %v896_v13  ;;  %v683_v40 = vmax.f32 %v634_v29, 0.0 }
 0x2c9   : > { %1091 = vmatmul.f32.gmra.mxu1 %v1045_v20  ;;  %v1010_v28 = vadd.f32 %v1002_v17, %v985_v21  ;;  %v877_v61 = vadd.f32 %v869_v48, %v852_v35  ;;  %v846_v19 = vmul.f32 %v1755_v23, %v682_v52  ;;  %v979_v60 = vmul.f32 %v1781_v58, %v682_v52 }
 0x2ca   : > { %v783_v42 = vrot.slane %v689_v34, 7  ;;  %v1003_v11 = vmul.f32 %v1797_v6, %v689_v34  ;;  %v870_v47 = vmul.f32 %v1765_v32, %v689_v34  ;;  %v945_v26 = vadd.f32 %v937_v0, %v920_v12 }
 0x2cb   : > { %v1026_v56 = vadd.f32 %v1018_v36, %v1010_v28  ;;  %v1019_v5 = vadd.f32 %v944_v50, %v877_v61  ;;  %v938_v23 = vmul.f32 %v1775_v41, %v675_v2 }
 0x2cc   : > { %v799_v62 = vsel %vm734_vm1, 0.0, %v783_v42 }
 0x2cd   : > { %v828_v4 = vmul.f32 %v1757_v24, %v799_v62  ;;  %v961_v31 = vmul.f32 %v1783_v59, %v799_v62  ;;  %v654_v63 = vpop.f32.mrf.mxu3  ;;  %v1038_v43 = vadd.f32 %v1817_v37, %v1026_v56 }
 0x2ce   : > { %v655_v30 = vadd.f32 %v1741_v10, %v654_v63 }
 0x2cf   : > { %v1046_v7 = vmax.f32 %v1038_v43, 0.0  ;;  %v986_v44 = vadd.f32 %v978_v38, %v961_v31  ;;  %v853_v9 = vadd.f32 %v845_v57, %v828_v4 }
 0x2d0   : > { %v690_v45 = vmax.f32 %v655_v30, 0.0 }
 0x2d1   : > { %1094 = vmatmul.f32.gmra.mxu1 %v1046_v7  ;;  %v1011_v54 = vadd.f32 %v1003_v11, %v986_v44  ;;  %v878_v20 = vadd.f32 %v870_v47, %v853_v9 }
 0x2d2   : > { %v784_v25 = vrot.slane %v690_v45, 7  ;;  %v871_v34 = vmul.f32 %v1765_v32, %v690_v45  ;;  %v1004_v28 = vmul.f32 %v1797_v6, %v690_v45 }
 0x2d3   : > { %v1027_v15 = vadd.f32 %v1019_v5, %v1011_v54  ;;  %v1020_v33 = vadd.f32 %v945_v26, %v878_v20 }
 0x2d4   : > { %v800_v17 = vsel %vm734_vm1, 0.0, %v784_v25 }
 0x2d5   : > { %v829_v21 = vmul.f32 %v1757_v24, %v800_v17  ;;  %v962_v27 = vmul.f32 %v1783_v59, %v800_v17  ;;  %v657_v22 = vpop.f32.mrf.mxu3  ;;  %v1039_v1 = vadd.f32 %v1817_v37, %v1027_v15  ;;  %v946_v24 = vadd.f32 %v938_v23, %v921_v14 }
 0x2d6   : > { %v658_v35 = vadd.f32 %v1741_v10, %v657_v22  ;;  %v980_v10 = vmul.f32 %v1781_v58, %v683_v40 }
 0x2d7   : > { %v854_v18 = vadd.f32 %v846_v19, %v829_v21  ;;  %v1047_v36 = vmax.f32 %v1039_v1, 0.0  ;;  %v987_v53 = vadd.f32 %v979_v60, %v962_v27 }
 0x2d8   : > { %v691_v49 = vmax.f32 %v658_v35, 0.0 }
 0x2d9   : > { %v879_v42 = vadd.f32 %v871_v34, %v854_v18  ;;  %1097 = vmatmul.f32.gmra.mxu1 %v1047_v36  ;;  %v1012_v46 = vadd.f32 %v1004_v28, %v987_v53 }
 0x2da   : > { %v785_v48 = vrot.slane %v691_v49, 7  ;;  %v1005_v38 = vmul.f32 %v1797_v6, %v691_v49 }
 0x2db   : > { %v1028_v39 = vadd.f32 %v1020_v33, %v1012_v46  ;;  %v1021_v41 = vadd.f32 %v946_v24, %v879_v42 }
 0x2dc   : > { %v801_v32 = vsel %vm734_vm1, 0.0, %v785_v48 }
 0x2dd   : > { %v963_v2 = vmul.f32 %v1783_v59, %v801_v32  ;;  %v1040_v56 = vadd.f32 %v1817_v37, %v1028_v39 }
 0x2df   : > { %v988_v55 = vadd.f32 %v980_v10, %v963_v2  ;;  %v1048_v3 = vmax.f32 %v1040_v56, 0.0 }
 0x2e1   : > { %v1013_v62 = vadd.f32 %v1005_v38, %v988_v55  ;;  %1100 = vmatmul.f32.gmra.mxu1 %v1048_v3 }
 0x2e3   : > { %v1029_v61 = vadd.f32 %v1021_v41, %v1013_v62 }
 0x2e5   : > { %v1041_v4 = vadd.f32 %v1817_v37, %v1029_v61 }
 0x2e7   : > { %v1049_v31 = vmax.f32 %v1041_v4, 0.0 }
 0x2e9   : > { %1103 = vmatmul.f32.gmra.mxu1 %v1049_v31 }
 0x32e   : > { %v1083_v63 = vpop.f32.mrf.mxu1 }
 0x32f   : > { %1107 = vst [vmem:[%s354_s18] sm:$0xff] %v1083_v63 }
 0x336   : > { %v1086_v58 = vpop.f32.mrf.mxu1 }
 0x337   : > { %1108 = vst [vmem:[%s354_s18 + $0x8] sm:$0xff] %v1086_v58 }
 0x33e   : > { %v1089_v59 = vpop.f32.mrf.mxu1 }
 0x33f   : > { %1109 = vst [vmem:[%s354_s18 + $0x10] sm:$0xff] %v1089_v59 }
 0x346   : > { %v1092_v43 = vpop.f32.mrf.mxu1 }
 0x347   : > { %1110 = vst [vmem:[%s354_s18 + $0x18] sm:$0xff] %v1092_v43 }
 0x34e   : > { %v1095_v6 = vpop.f32.mrf.mxu1 }
 0x34f   : > { %1111 = vst [vmem:[%s354_s18 + $0x20] sm:$0xff] %v1095_v6 }
 0x356   : > { %v1098_v50 = vpop.f32.mrf.mxu1 }
 0x357   : > { %1112 = vst [vmem:[%s354_s18 + $0x28] sm:$0xff] %v1098_v50 }
 0x35e   : > { %v1101_v37 = vpop.f32.mrf.mxu1 }
 0x35f   : > { %1113 = vst [vmem:[%s354_s18 + $0x30] sm:$0xff] %v1101_v37 }
 0x366   : > { %v1104_v51 = vpop.f32.mrf.mxu1 }
 0x367   : > { %1114 = vst [vmem:[%s354_s18 + $0x38] sm:$0xff] %v1104_v51 }
 0x368   : > { %1471 = shalt.err (!%p1468_p11)
}
 0x369   : > { %s1521_s15 = smov 128   ;;  %s1522_s18 = smov 8  }
 0x36a   : > { %1287 = dma.vmem_to_hbm [thread:$0]  (%p1637_p5), %s1129_s11, 1024, %s1131_s25, %s1116_s10, %s1521_s15, %s1521_s15, %s1522_s18  }
 0x36b PF: > { %s1145_s3 = sand.u32 1, %s1502_s27   ;;  %p2021_p12 = scmp.ge.s32.totalorder %s1514_s30, 2 }
 0x36c   : > { %s1146_s7 = scalar_lea.sflag [#allocation6], %s1145_s3 }
 0x36d   : > { %p1301_p13 = pnand %p2021_p12, %p1603_p6 }
 0x36f   : > { %p1302_p0 = pneg %p1301_p13 }
 0x371   : > { %1497 = dma.done.wait (%p1302_p0), %s1146_s7, 1024  }
 0x372   : > { %1499 = vsyncadd (%p1302_p0), %s1146_s7, 4294966272  ;;  %p22_p3 = scmp.ge.s32.totalorder %s1624_s26, 4   ;;  %s2022_s27 = smov %s1506_s28 }
 0x373   : > { %s2023_s28 = smov %s1510_s29  ;;  %s2024_s29 = smov %s1633_s14 }
 0x374   : > { %s2025_s30 = smov %s1624_s26  ;;  %24 = sbr.rel (!%p22_p3) target bundleno = 9 (0x9), region = 114 }
 0x379   :  { %1152 = vsyncpa [#allocation5], 1 }
 0x37a   :  { %1154 = vsyncpa [#allocation5 + $0x1], 1 }
 0x37b   :  { %1155 = vsyncpa [#allocation8], 1 }
 0x37c   :  { %1156 = vsyncpa [#allocation6], 1 }
 0x37d   :  { %1158 = vsyncpa [#allocation6 + $0x1], 1 }

</bundles_post_ra>
